<compile_context>
chip_gen: v6e
topology: v6e:2x2x1
jax: 0.10.0
libtpu: 0.0.40
codegen_flags: <defaults>
</compile_context>

<pallas_src>
import math
import functools

import jax
import jax.numpy as jnp
from jax.experimental import pallas as pl
from jax.experimental.pallas import tpu as pltpu


_LANE = 512                     # lane-dense last dim for the generic path (multiple of 128)
_TILE_BYTES = 4 * 1024 * 1024   # ~4 MiB per tile, safe on v5e/v6e/v7x


def _round_up(a, b):
    return -(-a // b) * b


def _cdiv(a, b):
    return -(-a // b)


def _module_wrapper_kernel(x_ref, o_ref, *, fn):
    # One (tile_rows, lanes) VMEM block per grid step; fn runs on VPU/EUP and
    # is (mostly) free filler under the HBM-bound DMA stream.
    o_ref[...] = fn(x_ref[...]).astype(o_ref.dtype)


def _choose_tile_rows(rows, row_bytes, sublane_align):
    """Row-tile ~= _TILE_BYTES, sublane-aligned, >=2 grid steps when possible."""
    if rows <= sublane_align:
        # Single block equal to the full (tiny) first dim -- allowed by the
        # (8,128) rule ("or equal the full array dims").
        return rows
    budget_rows = max(sublane_align,
                      (_TILE_BYTES // max(row_bytes, 1)) // sublane_align * sublane_align)
    tile_rows = min(budget_rows, _round_up(rows, sublane_align))
    # Guarantee >= 2 grid steps so v7x's two TensorCores both get work.
    if rows <= tile_rows and rows >= 2 * sublane_align:
        tile_rows = _round_up(_cdiv(rows, 2), sublane_align)
    return tile_rows


def _launch(x2d, fn, out_dtype, sublane_align):
    rows, lanes = x2d.shape
    itemsize = jnp.dtype(x2d.dtype).itemsize
    row_bytes = lanes * itemsize
    tile_rows = _choose_tile_rows(rows, row_bytes, sublane_align)
    grid = (pl.cdiv(rows, tile_rows),)

    tile_bytes = tile_rows * row_bytes
    # 2 buffers x (in + out) per tile, plus headroom for compiler scratch.
    vmem_limit = min(max(4 * tile_bytes + 8 * 1024 * 1024, 16 * 1024 * 1024),
                     56 * 1024 * 1024)

    n_elems = rows * lanes
    cost = pl.CostEstimate(
        flops=10 * n_elems,              # rough GELU-like elementwise cost
        transcendentals=n_elems,
        bytes_accessed=2 * n_elems * itemsize,
    )

    kernel = functools.partial(_module_wrapper_kernel, fn=fn)
    return pl.pallas_call(
        kernel,
        out_shape=jax.ShapeDtypeStruct((rows, lanes), out_dtype),
        grid=grid,
        in_specs=[pl.BlockSpec((tile_rows, lanes), lambda i: (i, 0))],
        out_specs=pl.BlockSpec((tile_rows, lanes), lambda i: (i, 0)),
        compiler_params=pltpu.CompilerParams(
            dimension_semantics=("parallel",),
            vmem_limit_bytes=vmem_limit,
        ),
        cost_estimate=cost,
    )(x2d)


def module_wrapper_forward(x, fn):
    """Pallas equivalent of ModuleWrapper(fn).forward(x) for elementwise fn."""
    orig_shape = x.shape
    orig_dtype = x.dtype
    total = math.prod(orig_shape) if orig_shape else 1
    if total == 0:
        return x

    itemsize = jnp.dtype(orig_dtype).itemsize
    # Sublane packing: 32-bit -> 8, 16-bit -> 16, 8-bit -> 32 rows per vreg.
    sublane_align = {4: 8, 2: 16, 1: 32}.get(itemsize, 8)

    # -------- fast path: last dim already lane-friendly (128-multiple) -------
    if len(orig_shape) >= 2 and orig_shape[-1] % 128 == 0:
        lanes = orig_shape[-1]
        rows = total // lanes
        x2d = x.reshape(rows, lanes)               # free for contiguous arrays
        out2d = _launch(x2d, fn, orig_dtype, sublane_align)
        return out2d.reshape(orig_shape)

    # -------- generic path: flatten to a lane-dense (rows, 512) slab ---------
    rows = _cdiv(total, _LANE)
    padded_total = rows * _LANE
    flat = x.reshape(-1)
    if padded_total != total:
        # Only pads the final partial lane-row (rare); still a copy, but the
        # old whole-tile round-up (full extra HBM pass) is gone.
        flat = jnp.pad(flat, (0, padded_total - total))
    x2d = flat.reshape(rows, _LANE)

    out2d = _launch(x2d, fn, orig_dtype, sublane_align)

    out_flat = out2d.reshape(-1)
    if padded_total != total:
        out_flat = out_flat[:total]
    return out_flat.reshape(orig_shape)


def gelu_exact(x):
    # Matches torch.nn.functional.gelu (default, erf-based) semantics.
    xf = x.astype(jnp.float32)
    return 0.5 * xf * (1.0 + jax.lax.erf(xf / jnp.sqrt(jnp.float32(2.0))))


if __name__ == "__main__":
    key = jax.random.PRNGKey(0)
    k0, k1 = jax.random.split(key)

    # ModuleWrapper(fn) with fn = GELU (a representative wrapped callable).
    # Generic-path shape (hidden=32 is not a 128-multiple).
    batch, seq, hidden = 2, 8, 32
    x = jax.random.normal(k0, (batch, seq, hidden), dtype=jnp.float32)
    y = jax.block_until_ready(module_wrapper_forward(x, gelu_exact))
    y_ref = gelu_exact(x)
    assert y.shape == x.shape and y.dtype == x.dtype
    assert jnp.allclose(y, y_ref, atol=1e-5, rtol=1e-5)

    # Fast-path shape (hidden=256 is a 128-multiple -> no flatten/pad).
    x_fast = jax.random.normal(k1, (2, 8, 256), dtype=jnp.float32)
    y_fast = jax.block_until_ready(module_wrapper_forward(x_fast, gelu_exact))
    y_fast_ref = gelu_exact(x_fast)
    assert y_fast.shape == x_fast.shape and y_fast.dtype == x_fast.dtype
    assert jnp.allclose(y_fast, y_fast_ref, atol=1e-5, rtol=1e-5)

    print("KERNEL_OK")
</pallas_src>

<mosaic_0001>
module attributes {stable_mosaic.version = 11 : i64} {
  func.func @_module_wrapper_kernel(%arg0: i32, %arg1: memref<1x512xf32, #tpu.memory_space<vmem>>, %arg2: memref<1x512xf32, #tpu.memory_space<vmem>>) attributes {dimension_semantics = [#tpu.dimension_semantics<parallel>], iteration_bounds = array<i64: 1>, scalar_prefetch = 0 : i64, scratch_operands = 0 : i64, tpu.core_type = #tpu.core_type<tc>, window_params = [{transform_indices = @transform_0, window_bounds = array<i64: 1, 512>}, {transform_indices = @transform_1, window_bounds = array<i64: 1, 512>}]} {
    %c0 = arith.constant 0 : index
    %c0_0 = arith.constant 0 : index
    %0 = vector.load %arg1[%c0, %c0_0] : memref<1x512xf32, #tpu.memory_space<vmem>>, vector<1x512xf32>
    %cst = arith.constant 5.000000e-01 : f32
    %1 = vector.broadcast %cst : f32 to vector<1x512xf32>
    %2 = arith.mulf %1, %0 : vector<1x512xf32>
    %cst_1 = arith.constant 2.000000e+00 : f32
    %3 = math.sqrt %cst_1 : f32
    %4 = vector.broadcast %3 : f32 to vector<1x512xf32>
    %5 = arith.divf %0, %4 : vector<1x512xf32>
    %6 = math.erf %5 : vector<1x512xf32>
    %cst_2 = arith.constant 1.000000e+00 : f32
    %7 = vector.broadcast %cst_2 : f32 to vector<1x512xf32>
    %8 = arith.addf %7, %6 : vector<1x512xf32>
    %9 = arith.mulf %2, %8 : vector<1x512xf32>
    %c0_3 = arith.constant 0 : index
    %c0_4 = arith.constant 0 : index
    %10 = vector.load %arg2[%c0_3, %c0_4] : memref<1x512xf32, #tpu.memory_space<vmem>>, vector<1x512xf32>
    tpu.vector_store %arg2[%c0_3, %c0_4], %9 {strides = array<i32>} : memref<1x512xf32, #tpu.memory_space<vmem>>, vector<1x512xf32>,
    return
  }
  func.func @transform_0(%arg0: i32) -> (i32, i32) {
    %c0_i32 = arith.constant 0 : i32
    %c0_i32_0 = arith.constant 0 : i32
    return %arg0, %c0_i32 : i32, i32
  }
  func.func @transform_1(%arg0: i32) -> (i32, i32) {
    %c0_i32 = arith.constant 0 : i32
    %c0_i32_0 = arith.constant 0 : i32
    return %arg0, %c0_i32 : i32, i32
  }
}

</mosaic_0001>

<bundles_post_ra>
// kernel: tpu_custom_call.1
= control target key start
LH: loop header
LB: loop body
LE: loop exit
PB: predicated region body
PF: predicated region fallthrough
CT: control target
= control target key end

     0   :  { %6 = vsyncpa [#allocation3], 0  ;;  %s114_s0 = inlined_call_operand.hbm [shape: f32[1,512], index: 0, kind: input, shape index: {}]   ;;  %s115_s1 = inlined_call_operand.hbm [shape: f32[1,512], index: 1, kind: output, shape index: {}]  }
   0x1   :  { %7 = vsyncpa [#allocation4], 0  ;;  %s96_s6 = smov [#allocation2]  }
   0x2   :  { %s14_s7 = sshll.u32 %s96_s6, 4  ;;  %s15_s7 = int_to_ptr.vmem [resolvable:$true] %s14_s7 }
   0x3   :  { %s60_s8 = scalar_lea.vmem %s15_s7, 64  ;;  %p65_p1 = scmp.lt.s32.totalorder %s15_s7, %s15_s7 }
   0x4   :  { %p61_p0 = scmp.ne.s32.totalorder %s15_s7, %s60_s8  ;;  %p66_p2 = scmp.lt.s32.totalorder %s60_s8, %s60_s8 }
   0x6   :  { %p67_p3 = por %p66_p2, %p65_p1 }
   0x8   :  { %p68_p4 = pnand %p67_p3, %p61_p0 }
   0xa   :  { %71 = shalt.err (!%p68_p4)
}
   0xb   :  { %17 = dma.hbm_to_vmem [thread:$0]  %s114_s0, 64, %s15_s7, [#allocation3]  }
   0xc   :  { %92 = dma.done.wait [#allocation3], 64  }
   0xd   :  { %93 = vsyncadd [#allocation3], 4294967232  ;;  %v21_v0 = vld [vmem:[#allocation2] sm:$0xf]  ;;  %v28_v2 = vlaneseq  ;;  %s97_s11 = smov [#allocation5]  }
   0xe   :  { %v24_v1 = vmul.f32 0.70710677, %v21_v0  ;;  %v22_v3 = vmul.f32 0.5, %v21_v0  ;;  %s39_s12 = sshll.u32 %s97_s11, 4  ;;  %s40_s12 = int_to_ptr.vmem [resolvable:$true] %s39_s12 }
   0xf   :  { %vm30_vm0 = vcmp.lt.s32.totalorder %v28_v2, 512  ;;  %s72_s13 = scalar_lea.vmem %s40_s12, 64  ;;  %p77_p6 = scmp.lt.s32.totalorder %s40_s12, %s40_s12 }
  0x10   :  { %50 = verf.f32 %v24_v1  ;;  %p73_p5 = scmp.ne.s32.totalorder %s40_s12, %s72_s13  ;;  %p78_p7 = scmp.lt.s32.totalorder %s72_s13, %s72_s13 }
  0x12   :  { %p79_p8 = por %p78_p7, %p77_p6 }
  0x14   :  { %p80_p9 = pnand %p79_p8, %p73_p5 }
  0x1d   :  { %v51_v4 = vpop.eup %50 }
  0x1e   :  { %v26_v5 = vadd.f32 1.0, %v51_v4 }
  0x20   :  { %v27_v6 = vmul.f32 %v26_v5, %v22_v3 }
  0x22   :  { %32 = vst.msk [vmem:[#allocation5] sm:$0xf] %vm30_vm0, %v27_v6 }
  0x23   :  { %83 = shalt.err (!%p80_p9)
}
  0x24   :  { %42 = dma.vmem_to_hbm [thread:$0]  %s40_s12, 64, %s115_s1, [#allocation4]  }
  0x25   :  { %94 = dma.done.wait [#allocation4], 64  }
  0x26   :  { %95 = vsyncadd [#allocation4], 4294967232 }
  0x27   :  { %46 = vsyncpa [#allocation3], 1 }
  0x28   :  { %47 = vsyncpa [#allocation4], 1 }

</bundles_post_ra>
